<compile_context>
chip_gen: v5e
topology: v5e:2x2
jax: 0.10.0
libtpu: 0.0.40
codegen_flags: <defaults>
</compile_context>

<pallas_src>
import jax
import jax.numpy as jnp
from jax.experimental import pallas as pl
from jax.experimental.pallas import tpu as pltpu


def _round_up(x, m):
    return ((x + m - 1) // m) * m


def _attn_kernel(q_ref, k_ref, v_ref, o_ref, acc_ref):
    # q_ref: (TM, Kp), k_ref: (Kp, TN), v_ref: (TN, TP), o_ref: (TM, TP)
    n = pl.program_id(3)

    @pl.when(n == 0)
    def _():
        acc_ref[...] = jnp.zeros_like(acc_ref)

    # First matmul: native-dtype operands (bf16 or f32), f32 result on the MXU.
    s = jnp.dot(q_ref[...], k_ref[...], preferred_element_type=jnp.float32)
    # Second matmul: feed operands in the input dtype (bf16 stays bf16, matching the
    # torch bf16 bmm chain; f32 is a no-op cast -> exact f32 semantics), accumulate f32.
    acc_ref[...] += jnp.dot(s.astype(v_ref.dtype), v_ref[...],
                            preferred_element_type=jnp.float32)

    @pl.when(n == pl.num_programs(3) - 1)
    def _():
        o_ref[...] = acc_ref[...].astype(o_ref.dtype)


def _vmem_capacity_bytes():
    try:
        cap = getattr(pltpu.get_tpu_info(), "vmem_capacity_bytes", None)
        if cap:
            return int(cap)
    except Exception:
        pass
    return 64 * 1024 * 1024  # conservative default (v7x per-core VMEM)


def _vmem_bytes(tm, tn, tp, kp, ebytes, out_bytes):
    # Double-buffered input blocks + double-buffered output block
    # + f32 accumulator scratch + f32 score temp + f32 second-dot result temp.
    blocks = 2 * ebytes * (tm * kp + kp * tn + tn * tp) + 2 * out_bytes * tm * tp
    temps = 4 * (tm * tp + tm * tn + tm * tp)
    return blocks + temps


def _choose_tiles(m8, n128, kp, p128, ebytes, out_bytes, budget):
    tm = min(256, m8)      # sublane multiple of 8; 256 keeps the MXU rows full
    tn = min(256, n128)    # contraction depth of 2nd matmul; 256 fills v6e/v7x MXU
    tp = p128              # whole (padded) P first; tile only if VMEM-bound

    def fits():
        return _vmem_bytes(tm, tn, tp, kp, ebytes, out_bytes) <= budget

    # Shrink order: tile P (parallel axis, keeps MXU shape) -> shrink tn -> shrink tm
    # (never below 128 unless truly forced).
    while not fits():
        if tp > 256:
            tp = _round_up(tp // 2, 128)
        elif tn > 128:
            tn = 128
        elif tp > 128:
            tp = 128
        elif tm > 128:
            tm = max(128, (tm // 2) // 8 * 8)
        elif tm > 8:
            tm = max(8, (tm // 2) // 8 * 8)
        else:
            break

    # Headroom (v5e/v6e: ~128 MiB VMEM): grow tm to cut K/V HBM re-streaming and
    # amortize per-grid-step overhead.
    for cand in (512, 1024):
        cand = min(cand, m8)
        if cand > tm and _vmem_bytes(cand, tn, tp, kp, ebytes, out_bytes) <= budget:
            tm = cand

    return tm, tn, tp


def _ensure_parallel_split(batch, m8, p128, tm, tp):
    # v7x has 2 TensorCores; make sure the parallel grid extent is >= 2 when possible.
    par = batch * pl.cdiv(m8, tm) * pl.cdiv(p128, tp)
    if par < 2 and m8 >= 256:
        tm = _round_up(pl.cdiv(m8, 2), 8)
    return tm


@jax.jit
def attention_bmm_bmm(q, k, v):
    """Pallas equivalent of torch.bmm(torch.bmm(q, k), v)."""
    B, M, K = q.shape
    Bk, K2, N = k.shape
    Bv, N2, P = v.shape
    assert B == Bk == Bv and K == K2 and N == N2

    out_dtype = jnp.result_type(q.dtype, k.dtype, v.dtype)
    compute_dtype = jnp.bfloat16 if out_dtype == jnp.bfloat16 else jnp.float32
    ebytes = jnp.dtype(compute_dtype).itemsize
    out_bytes = jnp.dtype(out_dtype).itemsize

    # Lane/sublane-aligned padded extents.
    Kp = _round_up(K, 128)
    M8 = _round_up(M, 8)
    N128 = _round_up(N, 128)
    P128 = _round_up(P, 128)

    capacity = _vmem_capacity_bytes()
    budget = max(32 * 1024 * 1024, int(0.60 * capacity))
    tm, tn, tp = _choose_tiles(M8, N128, Kp, P128, ebytes, out_bytes, budget)
    tm = _ensure_parallel_split(B, M8, P128, tm, tp)

    Mp = _round_up(M, tm)
    Np = _round_up(N, tn)
    Pp = _round_up(P, tp)

    def prep(x, d1, d2):
        x = x.astype(compute_dtype)  # no-op when dtype already matches
        pad1, pad2 = d1 - x.shape[1], d2 - x.shape[2]
        if pad1 or pad2:             # zero padding is exact for this matmul chain
            x = jnp.pad(x, ((0, 0), (0, pad1), (0, pad2)))
        return x

    qp = prep(q, Mp, Kp)
    kp = prep(k, Kp, Np)
    vp = prep(v, Np, Pp)

    grid = (B, Mp // tm, Pp // tp, Np // tn)

    grid_spec = pltpu.PrefetchScalarGridSpec(
        num_scalar_prefetch=0,
        grid=grid,
        in_specs=[
            pl.BlockSpec((pl.Squeezed(), tm, Kp), lambda b, i, j, n: (b, i, 0)),
            pl.BlockSpec((pl.Squeezed(), Kp, tn), lambda b, i, j, n: (b, 0, n)),
            pl.BlockSpec((pl.Squeezed(), tn, tp), lambda b, i, j, n: (b, n, j)),
        ],
        out_specs=pl.BlockSpec((pl.Squeezed(), tm, tp), lambda b, i, j, n: (b, i, j)),
        scratch_shapes=[pltpu.VMEM((tm, tp), jnp.float32)],
    )

    needed = _vmem_bytes(tm, tn, tp, Kp, ebytes, out_bytes)
    vmem_limit = int(min(int(0.90 * capacity),
                         max(needed + 16 * 1024 * 1024, 48 * 1024 * 1024)))

    m_tiles, p_tiles = Mp // tm, Pp // tp
    cost = pl.CostEstimate(
        flops=2 * B * (M * K * N + M * N * P),
        transcendentals=0,
        bytes_accessed=(ebytes * B * (M * K + m_tiles * p_tiles * K * N + m_tiles * N * P)
                        + out_bytes * B * M * P),
    )

    out = pl.pallas_call(
        _attn_kernel,
        out_shape=jax.ShapeDtypeStruct((B, Mp, Pp), out_dtype),
        grid_spec=grid_spec,
        compiler_params=pltpu.CompilerParams(
            dimension_semantics=("parallel", "parallel", "parallel", "arbitrary"),
            vmem_limit_bytes=vmem_limit,
        ),
        cost_estimate=cost,
    )(qp, kp, vp)

    if Mp != M or Pp != P:
        out = out[:, :M, :P]
    return out


if __name__ == "__main__":
    # Small, deterministic example shapes consistent with torch.bmm semantics.
    B, M, K, N, P = 2, 8, 32, 16, 32
    key = jax.random.PRNGKey(0)
    kq, kk, kv = jax.random.split(key, 3)
    q = jax.random.normal(kq, (B, M, K), dtype=jnp.float32)
    k = jax.random.normal(kk, (B, K, N), dtype=jnp.float32)
    v = jax.random.normal(kv, (B, N, P), dtype=jnp.float32)

    # f32 path (exact torch.bmm f32 semantics).
    out = jax.block_until_ready(attention_bmm_bmm(q, k, v))
    ref = jnp.einsum("bmn,bnp->bmp", jnp.einsum("bmk,bkn->bmn", q, k), v)
    assert out.shape == (B, M, P) and out.dtype == jnp.float32
    assert jnp.allclose(out, ref, atol=1e-4, rtol=1e-4)

    # bf16 path (MXU-native bf16 x bf16 -> f32 accumulation, bf16 output).
    qb, kb, vb = (x.astype(jnp.bfloat16) for x in (q, k, v))
    out_b = jax.block_until_ready(attention_bmm_bmm(qb, kb, vb))
    s_ref = jnp.einsum("bmk,bkn->bmn", qb, kb,
                       preferred_element_type=jnp.float32).astype(jnp.bfloat16)
    ref_b = jnp.einsum("bmn,bnp->bmp", s_ref, vb,
                       preferred_element_type=jnp.float32).astype(jnp.bfloat16)
    assert out_b.shape == (B, M, P) and out_b.dtype == jnp.bfloat16
    assert jnp.allclose(out_b.astype(jnp.float32), ref_b.astype(jnp.float32),
                        atol=0.5, rtol=5e-2)

    print("KERNEL_OK")
</pallas_src>

<mosaic_0001>
module attributes {stable_mosaic.version = 11 : i64} {
  func.func @_attn_kernel(%arg0: i32, %arg1: i32, %arg2: i32, %arg3: i32, %arg4: memref<1x8x128xf32, #tpu.memory_space<vmem>>, %arg5: memref<1x128x128xf32, #tpu.memory_space<vmem>>, %arg6: memref<1x128x128xf32, #tpu.memory_space<vmem>>, %arg7: memref<1x8x128xf32, #tpu.memory_space<vmem>>, %arg8: memref<8x128xf32, #tpu.memory_space<vmem>>) attributes {dimension_semantics = [#tpu.dimension_semantics<parallel>, #tpu.dimension_semantics<parallel>, #tpu.dimension_semantics<parallel>, #tpu.dimension_semantics<arbitrary>], iteration_bounds = array<i64: 2, 1, 1, 1>, scalar_prefetch = 0 : i64, scratch_operands = 1 : i64, tpu.core_type = #tpu.core_type<tc>, window_params = [{transform_indices = @transform_0, window_bounds = array<i64: 1, 8, 128>}, {transform_indices = @transform_1, window_bounds = array<i64: 1, 128, 128>}, {transform_indices = @transform_2, window_bounds = array<i64: 1, 128, 128>}, {transform_indices = @transform_3, window_bounds = array<i64: 1, 8, 128>}]} {
    %c0_i32 = arith.constant 0 : i32
    %0 = arith.cmpi eq, %arg3, %c0_i32 : i32
    %1 = arith.extui %0 : i1 to i32
    %c0_i32_0 = arith.constant 0 : i32
    %2 = arith.cmpi ne, %1, %c0_i32_0 : i32
    scf.if %2 {
      %cst_16 = arith.constant 0.000000e+00 : f32
      %17 = vector.broadcast %cst_16 : f32 to vector<8x128xf32>
      %c0_17 = arith.constant 0 : index
      %c0_18 = arith.constant 0 : index
      %18 = vector.load %arg8[%c0_17, %c0_18] : memref<8x128xf32, #tpu.memory_space<vmem>>, vector<8x128xf32>
      tpu.vector_store %arg8[%c0_17, %c0_18], %17 {strides = array<i32>} : memref<8x128xf32, #tpu.memory_space<vmem>>, vector<8x128xf32>,
    } else {
    }
    %c0 = arith.constant 0 : index
    %c0_1 = arith.constant 0 : index
    %c0_2 = arith.constant 0 : index
    %3 = vector.load %arg4[%c0, %c0_1, %c0_2] : memref<1x8x128xf32, #tpu.memory_space<vmem>>, vector<1x8x128xf32>
    %4 = vector.shape_cast %3 : vector<1x8x128xf32> to vector<8x128xf32>
    %c0_3 = arith.constant 0 : index
    %c0_4 = arith.constant 0 : index
    %c0_5 = arith.constant 0 : index
    %5 = vector.load %arg5[%c0_3, %c0_4, %c0_5] : memref<1x128x128xf32, #tpu.memory_space<vmem>>, vector<1x128x128xf32>
    %6 = vector.shape_cast %5 : vector<1x128x128xf32> to vector<128x128xf32>
    %cst = arith.constant dense<0.000000e+00> : vector<8x128xf32>
    %7 = tpu.matmul %4, %6, %cst {dimension_numbers = #tpu.dot_dimension_numbers<[1], [0], [0], [1], [0, 0, 1, 1], [], []>} : vector<8x128xf32>, vector<128x128xf32>, vector<8x128xf32> -> vector<8x128xf32>
    %c0_6 = arith.constant 0 : index
    %c0_7 = arith.constant 0 : index
    %8 = vector.load %arg8[%c0_6, %c0_7] : memref<8x128xf32, #tpu.memory_space<vmem>>, vector<8x128xf32>
    %c0_8 = arith.constant 0 : index
    %c0_9 = arith.constant 0 : index
    %c0_10 = arith.constant 0 : index
    %9 = vector.load %arg6[%c0_8, %c0_9, %c0_10] : memref<1x128x128xf32, #tpu.memory_space<vmem>>, vector<1x128x128xf32>
    %10 = vector.shape_cast %9 : vector<1x128x128xf32> to vector<128x128xf32>
    %cst_11 = arith.constant dense<0.000000e+00> : vector<8x128xf32>
    %11 = tpu.matmul %7, %10, %cst_11 {dimension_numbers = #tpu.dot_dimension_numbers<[1], [0], [0], [1], [0, 0, 1, 1], [], []>} : vector<8x128xf32>, vector<128x128xf32>, vector<8x128xf32> -> vector<8x128xf32>
    %12 = arith.addf %8, %11 : vector<8x128xf32>
    %c0_12 = arith.constant 0 : index
    %c0_13 = arith.constant 0 : index
    %13 = vector.load %arg8[%c0_12, %c0_13] : memref<8x128xf32, #tpu.memory_space<vmem>>, vector<8x128xf32>
    tpu.vector_store %arg8[%c0_12, %c0_13], %12 {strides = array<i32>} : memref<8x128xf32, #tpu.memory_space<vmem>>, vector<8x128xf32>,
    %c0_i32_14 = arith.constant 0 : i32
    %14 = arith.cmpi eq, %arg3, %c0_i32_14 : i32
    %15 = arith.extui %14 : i1 to i32
    %c0_i32_15 = arith.constant 0 : i32
    %16 = arith.cmpi ne, %15, %c0_i32_15 : i32
    scf.if %16 {
      %c0_16 = arith.constant 0 : index
      %c0_17 = arith.constant 0 : index
      %17 = vector.load %arg8[%c0_16, %c0_17] : memref<8x128xf32, #tpu.memory_space<vmem>>, vector<8x128xf32>
      %c0_18 = arith.constant 0 : index
      %c0_19 = arith.constant 0 : index
      %c0_20 = arith.constant 0 : index
      %18 = vector.load %arg7[%c0_18, %c0_19, %c0_20] : memref<1x8x128xf32, #tpu.memory_space<vmem>>, vector<1x8x128xf32>
      %19 = vector.shape_cast %18 : vector<1x8x128xf32> to vector<8x128xf32>
      %20 = vector.shape_cast %17 : vector<8x128xf32> to vector<1x8x128xf32>
      tpu.vector_store %arg7[%c0_18, %c0_19, %c0_20], %20 {strides = array<i32>} : memref<1x8x128xf32, #tpu.memory_space<vmem>>, vector<1x8x128xf32>,
    } else {
    }
    return
  }
  func.func @transform_0(%arg0: i32, %arg1: i32, %arg2: i32, %arg3: i32) -> (i32, i32, i32) {
    %c0_i32 = arith.constant 0 : i32
    %c0_i32_0 = arith.constant 0 : i32
    return %arg0, %arg1, %c0_i32 : i32, i32, i32
  }
  func.func @transform_1(%arg0: i32, %arg1: i32, %arg2: i32, %arg3: i32) -> (i32, i32, i32) {
    %c0_i32 = arith.constant 0 : i32
    %c0_i32_0 = arith.constant 0 : i32
    return %arg0, %c0_i32, %arg3 : i32, i32, i32
  }
  func.func @transform_2(%arg0: i32, %arg1: i32, %arg2: i32, %arg3: i32) -> (i32, i32, i32) {
    %c0_i32 = arith.constant 0 : i32
    return %arg0, %arg3, %arg2 : i32, i32, i32
  }
  func.func @transform_3(%arg0: i32, %arg1: i32, %arg2: i32, %arg3: i32) -> (i32, i32, i32) {
    %c0_i32 = arith.constant 0 : i32
    return %arg0, %arg1, %arg2 : i32, i32, i32
  }
}

</mosaic_0001>

<bundles_post_ra>
// kernel: attention_bmm_bmm.1
= control target key start
LH: loop header
LB: loop body
LE: loop exit
PB: predicated region body
PF: predicated region fallthrough
CT: control target
= control target key end

     0   :  { %8 = vsyncpa [#allocation4], 0  ;;  %s821_s0 = inlined_call_operand.vmem [shape: f32[2,8,128], index: 0, kind: input, shape index: {}]   ;;  %s822_s1 = inlined_call_operand.vmem [shape: f32[2,128,128], index: 1, kind: input, shape index: {}]   ;;  %s823_s2 = inlined_call_operand.vmem [shape: f32[2,128,128], index: 2, kind: input, shape index: {}]   ;;  %s824_s3 = inlined_call_operand.hbm [shape: f32[2,8,128], index: 3, kind: output, shape index: {}]  }
   0x1   :  { %10 = vsyncpa [#allocation4 + $0x1], 0  ;;  %s678_s12 = smov 0   ;;  %s680_s13 = smov 0  }
   0x2   :  { %s682_s14 = smov 0   ;;  %s684_s15 = smov 0  }
   0x3   :  { %s686_s16 = smov 0   ;;  %s688_s17 = smov 0  }
   0x4 LB: > { %s506_s18 = sadd.s32 4294967295, %s656_s17   ;;  %s507_s19 = sadd.s32 4294967294, %s656_s17   ;;  %s656_s17 = sphi %s688_s17, %s16_s17   ;;  %s652_s16 = sphi %s686_s16, %s831_s16   ;;  %s648_s15 = sphi %s684_s15, %s830_s15   ;;  %s644_s14 = sphi %s682_s14, %s829_s14   ;;  %s640_s13 = sphi %s680_s13, %s828_s13   ;;  %s636_s12 = sphi %s678_s12, %s827_s12  }
   0x5   : > { %s42_s20 = sadd.s32 1, %s652_s16  ;;  %s139_s21 = sadd.s32 1, %s644_s14 }
   0x6   : > { %p44_p0 = scmp.ge.s32.totalorder %s42_s20, 2  ;;  %p149_p1 = scmp.ne.s32.totalorder %s644_s14, %s640_s13 }
   0x7   : > { %p150_p2 = scmp.eq.s32.totalorder %s506_s18, 1  ;;  %p155_p3 = scmp.ne.s32.totalorder %s640_s13, %s636_s12 }
   0x8   : > { %s833_s20 = smov (%p44_p0, %s42_s20), 0  ;;  %p156_p5 = scmp.eq.s32.totalorder %s507_s19, 1 }
   0x9   : > { %p718_p4 = por %p150_p2, %p149_p1  ;;  %s132_s23 = ssub.s32 %s652_s16, %s833_s20 }
   0xa   : > { %p510_p6 = scmp.ge.s32.totalorder %s656_s17, 1  ;;  %p137_p7 = scmp.eq.s32.totalorder %s132_s23, 0 }
   0xb   : > { %p725_p8 = por %p156_p5, %p155_p3  ;;  %p211_p9 = scmp.lt.s32.totalorder %s656_s17, 3 }
   0xc   : > { %s731_s25 = scalar_select %p137_p7, %s644_s14, %s139_s21  }
   0xd   : > { %p212_p10 = pnand %p510_p6, %p211_p9 }
   0xe   : > { %p257_p11 = scmp.lt.s32.totalorder (!%p212_p10), %s648_s15, 1  ;;  %s254_s11 = sand.u32 (!%p212_p10), 1, %s640_s13  }
   0xf   : > { %215 = sbr.rel (%p212_p10) target bundleno = 311 (0x137), region = 32  ;;  %s511_s18 = sshll.u32 (!%p212_p10), %s254_s11, 3 }
  0x10   : > { %s518_s19 = sshll.u32 (!%p212_p10), %s648_s15, 3 }
  0x14   : > { %s735_s26 = scalar_select %p257_p11, %s648_s15, 1 }
  0x16   : > { %s521_s27 = sshll.u32 %s735_s26, 7  ;;  %s512_s7 = sshll.u32 %s735_s26, 3 }
  0x17   : > { %s741_s30 = scalar_lea.vmem %s822_s1, %s521_s27  ;;  %s749_s6 = scalar_lea.vmem %s823_s2, %s521_s27 }
  0x18   : > { %v306_v0 = vld [vmem:[%s741_s30 + $0x78] sm:$0xff]  ;;  %v305_v1 = vld [vmem:[%s741_s30 + $0x70] sm:$0xff]  ;;  %v304_v2 = vld [vmem:[%s741_s30 + $0x68] sm:$0xff]  ;;  %s263_s10 = scalar_lea.vmem %s821_s0, %s512_s7  ;;  %s384_s26 = scalar_lea.hbm %s824_s3, %s518_s19 }
  0x19   : > { %307 = vmatpush.msra.mxu0 %v306_v0  ;;  %v303_v3 = vld [vmem:[%s741_s30 + $0x60] sm:$0xff]  ;;  %v343_v4 = vld [vmem:[%s749_s6 + $0x78] sm:$0xff]  ;;  %v342_v6 = vld [vmem:[%s749_s6 + $0x70] sm:$0xff]  ;;  %s256_s27 = scalar_lea.vmem [#allocation3], %s511_s18  ;;  %s388_s29 = sshll.u32 %s384_s26, 4  ;;  %s389_s29 = int_to_ptr.hbm [resolvable:$true] %s388_s29 }
  0x1a   : > { %v302_v5 = vld [vmem:[%s741_s30 + $0x58] sm:$0xff]  ;;  %344 = vmatpush.msra.mxu1 %v343_v4  ;;  %v341_v7 = vld [vmem:[%s749_s6 + $0x68] sm:$0xff]  ;;  %v301_v8 = vld [vmem:[%s741_s30 + $0x50] sm:$0xff]  ;;  %s386_s28 = sshll.u32 %s256_s27, 4  ;;  %s592_s4 = sshra.s32 %s389_s29, 4  ;;  %s387_s28 = int_to_ptr.vmem [resolvable:$true] %s386_s28  ;;  %s593_s4 = int_to_ptr.hbm [resolvable:$true] %s592_s4 }
  0x1b   : > { %308 = vmatpush.msra.mxu0 %v305_v1  ;;  %v340_v9 = vld [vmem:[%s749_s6 + $0x60] sm:$0xff]  ;;  %v300_v10 = vld [vmem:[%s741_s30 + $0x48] sm:$0xff]  ;;  %v339_v11 = vld [vmem:[%s749_s6 + $0x58] sm:$0xff]  ;;  %s594_s5 = scalar_lea.hbm %s593_s4, 8  ;;  %s598_s7 = scalar_lea.hbm %s824_s3, 16 }
  0x1c   : > { %345 = vmatpush.msra.mxu1 %v342_v6  ;;  %v299_v12 = vld [vmem:[%s741_s30 + $0x40] sm:$0xff]  ;;  %v338_v13 = vld [vmem:[%s749_s6 + $0x50] sm:$0xff]  ;;  %v298_v14 = vld [vmem:[%s741_s30 + $0x38] sm:$0xff]  ;;  %p595_p12 = scmp.ne.s32.totalorder %s593_s4, %s594_s5  ;;  %p599_p1 = scmp.lt.s32.totalorder %s593_s4, %s824_s3 }
  0x1d   : > { %309 = vmatpush.msra.mxu0 %v304_v2  ;;  %v337_v15 = vld [vmem:[%s749_s6 + $0x48] sm:$0xff]  ;;  %v297_v16 = vld [vmem:[%s741_s30 + $0x30] sm:$0xff]  ;;  %v336_v17 = vld [vmem:[%s749_s6 + $0x40] sm:$0xff]  ;;  %p600_p2 = scmp.lt.s32.totalorder %s598_s7, %s594_s5 }
  0x1e   : > { %346 = vmatpush.msra.mxu1 %v341_v7  ;;  %v296_v18 = vld [vmem:[%s741_s30 + $0x28] sm:$0xff]  ;;  %v335_v19 = vld [vmem:[%s749_s6 + $0x38] sm:$0xff]  ;;  %v295_v20 = vld [vmem:[%s741_s30 + $0x20] sm:$0xff]  ;;  %p596_p13 = pnand %p595_p12, %p718_p4 }
  0x1f   : > { %310 = vmatpush.msra.mxu0 %v303_v3  ;;  %v334_v21 = vld [vmem:[%s749_s6 + $0x30] sm:$0xff]  ;;  %v294_v22 = vld [vmem:[%s741_s30 + $0x18] sm:$0xff]  ;;  %v333_v23 = vld [vmem:[%s749_s6 + $0x28] sm:$0xff]  ;;  %p601_p3 = por %p600_p2, %p599_p1 }
  0x20   : > { %347 = vmatpush.msra.mxu1 %v340_v9  ;;  %v293_v24 = vld [vmem:[%s741_s30 + $0x10] sm:$0xff]  ;;  %v332_v25 = vld [vmem:[%s749_s6 + $0x20] sm:$0xff]  ;;  %v292_v26 = vld [vmem:[%s741_s30 + $0x8] sm:$0xff]  ;;  %p597_p0 = pneg %p596_p13 }
  0x21   : > { %311 = vmatpush.msra.mxu0 %v302_v5  ;;  %v331_v27 = vld [vmem:[%s749_s6 + $0x18] sm:$0xff]  ;;  %v291_v28 = vld [vmem:[%s741_s30] sm:$0xff]  ;;  %v330_v30 = vld [vmem:[%s749_s6 + $0x10] sm:$0xff]  ;;  %s372_s30 = scalar_lea.sflag [#allocation4], %s254_s11 }
  0x22   : > { %348 = vmatpush.msra.mxu1 %v339_v11  ;;  %v290_v29 = vld [vmem:[%s263_s10] sm:$0xff]  ;;  %v329_v31 = vld [vmem:[%s749_s6 + $0x8] sm:$0xff]  ;;  %p602_p5 = pnand %p601_p3, %p597_p0 }
  0x23   : > { %312 = vmatpush.msra.mxu0 %v301_v8  ;;  %v328_v32 = vld [vmem:[%s749_s6] sm:$0xff] }
  0x24   : > { %349 = vmatpush.msra.mxu1 %v338_v13 }
  0x25   : > { %313 = vmatpush.msra.mxu0 %v300_v10 }
  0x26   : > { %350 = vmatpush.msra.mxu1 %v337_v15 }
  0x27   : > { %314 = vmatpush.msra.mxu0 %v299_v12 }
  0x28   : > { %351 = vmatpush.msra.mxu1 %v336_v17 }
  0x29   : > { %315 = vmatpush.msra.mxu0 %v298_v14 }
  0x2a   : > { %352 = vmatpush.msra.mxu1 %v335_v19 }
  0x2b   : > { %316 = vmatpush.msra.mxu0 %v297_v16 }
  0x2c   : > { %353 = vmatpush.msra.mxu1 %v334_v21 }
  0x2d   : > { %317 = vmatpush.msra.mxu0 %v296_v18 }
  0x2e   : > { %354 = vmatpush.msra.mxu1 %v333_v23 }
  0x2f   : > { %318 = vmatpush.msra.mxu0 %v295_v20 }
  0x30   : > { %355 = vmatpush.msra.mxu1 %v332_v25 }
  0x31   : > { %319 = vmatpush.msra.mxu0 %v294_v22 }
  0x32   : > { %356 = vmatpush.msra.mxu1 %v331_v27 }
  0x33   : > { %320 = vmatpush.msra.mxu0 %v293_v24 }
  0x34   : > { %357 = vmatpush.msra.mxu1 %v330_v30 }
  0x35   : > { %321 = vmatpush.msra.mxu0 %v292_v26 }
  0x36   : > { %358 = vmatpush.msra.mxu1 %v329_v31 }
  0x37   : > { %322 = vmatpush.msra.mxu0 %v291_v28 }
  0x38   : > { %323 = vmatmul.f32.vlgmr.msra.gmra.mxu0 %v290_v29  ;;  %359 = vmatpush.msra.mxu1 %v328_v32 }
  0xb5   : > { %v324_v33 = vpop.f32.mrf.mxu0 }
  0xb6   : > { %360 = vmatmul.f32.vlgmr.msra.gmra.mxu1 %v324_v33 }
 0x133   : > { %v361_v34 = vpop.f32.mrf.mxu1 }
 0x134   : > { %370 = vst [vmem:[%s256_s27] sm:$0xff] %v361_v34 }
 0x135   : > { %605 = shalt.err (!%p602_p5)
}
 0x136   : > { %523 = dma.vmem_to_hbm [thread:$0]  (%p718_p4), %s387_s28, 128, %s389_s29, %s372_s30  }
 0x137 PF: > { %p529_p6 = scmp.ge.s32.totalorder %s656_s17, 2  ;;  %s400_s10 = sand.u32 1, %s636_s12  }
 0x138   : > { %s401_s11 = scalar_lea.sflag [#allocation4], %s400_s10 }
 0x139   : > { %p526_p7 = pnand %p529_p6, %p725_p8 }
 0x13b   : > { %p527_p9 = pneg %p526_p7 }
 0x13d   : > { %631 = dma.done.wait (%p527_p9), %s401_s11, 128  }
 0x13e   : > { %633 = vsyncadd (%p527_p9), %s401_s11, 4294967168  ;;  %s16_s17 = sadd.s32 1, %s656_s17   ;;  %s827_s12 = smov %s640_s13 }
 0x13f   : > { %p13_p10 = scmp.ge.s32.totalorder %s16_s17, 4   ;;  %s828_s13 = smov %s644_s14 }
 0x140   : > { %s829_s14 = smov %s731_s25  ;;  %s830_s15 = smov %s652_s16 }
 0x141   : > { %s831_s16 = smov %s833_s20  ;;  %15 = sbr.rel (!%p13_p10) target bundleno = 4 (0x4), region = 81 }
 0x146   :  { %407 = vsyncpa [#allocation4], 1 }
 0x147   :  { %409 = vsyncpa [#allocation4 + $0x1], 1 }

</bundles_post_ra>
